<compile_context>
chip_gen: v7x
topology: tpu7x:2x2x1
jax: 0.10.0
libtpu: 0.0.40
codegen_flags: <defaults>
</compile_context>

<pallas_src>
import functools
import math

import jax
import jax.numpy as jnp
from jax.experimental import pallas as pl
from jax.experimental.pallas import tpu as pltpu

BN_EPS = 1e-3
_NEG_BIAS = -1e30                     # pad value for scale-head bias (=> exp -> 0)
_VMEM_LIMIT_BYTES = 48 * 1024 * 1024  # fits the scoped VMEM budget on v5e/v6e/v7x


def _round_up(x, m):
    return ((x + m - 1) // m) * m


# ---------------------------------------------------------------------------
# Pass 1: backbone (Linear -> BatchNorm1d(train) -> ReLU) + online softmax stats
# ---------------------------------------------------------------------------
def _backbone_stats_kernel(x_ref, w1_ref, b1_ref, gamma_ref, beta_ref,
                           ws_ref, bs_ref,
                           h_ref, m_ref, l_ref):
    """Grid: (num_gene_tiles,) marked 'arbitrary' (sequential m/l accumulation).

    h_ref / m_ref / l_ref have constant index maps -> resident accumulators written
    back to HBM once at the end of the grid.
    """
    j = pl.program_id(0)

    @pl.when(j == 0)
    def _init():
        x = x_ref[...]
        h = jnp.dot(x, w1_ref[...], preferred_element_type=jnp.float32) + b1_ref[...]
        # BatchNorm1d (training): batch mean, *biased* batch variance, eps=1e-3,
        # folded into a single scale/shift.
        mean = jnp.mean(h, axis=0, keepdims=True)
        var = jnp.mean((h - mean) ** 2, axis=0, keepdims=True)
        s = gamma_ref[...] * jax.lax.rsqrt(var + BN_EPS)
        t = beta_ref[...] - mean * s
        h = jnp.maximum(h * s + t, 0.0)          # ReLU; dropout(p=0) is a no-op
        h_ref[...] = h.astype(h_ref.dtype)       # bf16 copy reused by both passes
        m_ref[...] = jnp.full(m_ref.shape, -jnp.inf, m_ref.dtype)
        l_ref[...] = jnp.zeros(l_ref.shape, l_ref.dtype)

    # Online softmax statistics over this gene tile of the scale head.
    logits = jnp.dot(h_ref[...], ws_ref[...],
                     preferred_element_type=jnp.float32) + bs_ref[...]
    m_old = m_ref[...]
    m_new = jnp.maximum(m_old, jnp.max(logits, axis=-1, keepdims=True))
    l_ref[...] = (jnp.exp(m_old - m_new) * l_ref[...]
                  + jnp.sum(jnp.exp(logits - m_new), axis=-1, keepdims=True))
    m_ref[...] = m_new


# ---------------------------------------------------------------------------
# Pass 2: fused head projections + normalized outputs (one gene tile per step)
# ---------------------------------------------------------------------------
def _heads_kernel(h_ref, m_ref, l_ref, lib_ref, w_ref, b_ref, *out_refs, use_r):
    """Grid: (num_gene_tiles,) marked 'parallel'. One fused MXU pass over all heads."""
    if use_r:
        scale_ref, r_ref, rate_ref, drop_ref = out_refs
    else:
        scale_ref, rate_ref, drop_ref = out_refs
        r_ref = None
    tn = scale_ref.shape[-1]

    out = jnp.dot(h_ref[...], w_ref[0],
                  preferred_element_type=jnp.float32) + b_ref[0]   # (B, n_heads*tn)

    s_logits = out[:, :tn]
    if use_r:
        r_ref[...] = out[:, tn:2 * tn]
        d_out = out[:, 2 * tn:3 * tn]
    else:
        d_out = out[:, tn:2 * tn]

    inv_l = 1.0 / l_ref[...]                                       # (B, 1)
    px_scale = jnp.exp(s_logits - m_ref[...]) * inv_l              # global softmax
    scale_ref[...] = px_scale
    rate_ref[...] = jnp.exp(lib_ref[...]) * px_scale
    drop_ref[...] = d_out


# ---------------------------------------------------------------------------
# Parameter preparation (padding, bf16 cast, per-tile head packing) — done once
# ---------------------------------------------------------------------------
def _pad_cols(a, g_pad, fill=0.0):
    g = a.shape[-1]
    if g == g_pad:
        return a
    pad = jnp.full(a.shape[:-1] + (g_pad - g,), fill, a.dtype)
    return jnp.concatenate([a, pad], axis=-1)


def prepare_decoder_params(params, *, dispersion="gene-cell", block_n=1024):
    """Pad the gene axis, cast head weights to bf16 and pack them per gene tile."""
    use_r = dispersion == "gene-cell"
    ws, bs = params["w_scale"], params["b_scale"]
    wd, bd = params["w_drop"], params["b_drop"]
    wr, br = params["w_r"], params["b_r"]
    n_hidden, n_output = ws.shape

    tn = _round_up(min(block_n, _round_up(n_output, 128)), 128)
    g_pad = _round_up(n_output, tn)
    num_tiles = g_pad // tn

    heads_w = [ws] + ([wr] if use_r else []) + [wd]
    heads_b = [bs] + ([br] if use_r else []) + [bd]
    bias_fill = [_NEG_BIAS] + [0.0] * (len(heads_b) - 1)
    n_heads = len(heads_w)

    w_pad = [_pad_cols(w.astype(jnp.float32), g_pad, 0.0) for w in heads_w]
    b_pad = [_pad_cols(b.astype(jnp.float32).reshape(1, -1), g_pad, f)
             for b, f in zip(heads_b, bias_fill)]

    # Interleave per tile: (n_heads, H, g_pad) -> (num_tiles, H, n_heads*tn)
    w_stack = jnp.stack(w_pad, axis=0).astype(jnp.bfloat16)
    w_heads = (w_stack.reshape(n_heads, n_hidden, num_tiles, tn)
               .transpose(2, 1, 0, 3)
               .reshape(num_tiles, n_hidden, n_heads * tn))
    b_stack = jnp.concatenate(b_pad, axis=0)                       # (n_heads, g_pad)
    b_heads = (b_stack.reshape(n_heads, num_tiles, tn)
               .transpose(1, 0, 2)
               .reshape(num_tiles, 1, n_heads * tn))

    return {
        "n_cat_list": params["n_cat_list"],
        "n_hidden": n_hidden,
        "n_output": n_output,
        "g_pad": g_pad,
        "block_n": tn,
        "num_tiles": num_tiles,
        "n_heads": n_heads,
        "use_r": use_r,
        # backbone (tiny; kept f32 for exact BatchNorm statistics)
        "w1": params["w1"].astype(jnp.float32),
        "b1": params["b1"].astype(jnp.float32),
        "gamma": params["gamma"].astype(jnp.float32),
        "beta": params["beta"].astype(jnp.float32),
        # scale head streamed alone in pass 1 (bf16 weights, f32 bias with -1e30 pad)
        "w_scale_p": w_pad[0].astype(jnp.bfloat16),
        "b_scale_p": b_pad[0],
        # fused heads streamed in pass 2
        "w_heads": w_heads,
        "b_heads": b_heads,
    }


# ---------------------------------------------------------------------------
# Forward wrapper
# ---------------------------------------------------------------------------
def decoder_scvi_forward(prep, z, library, *cat_list):
    """DecoderSCVI.forward: returns (px_scale, px_r, px_rate, px_dropout)."""
    one_hots = []
    for n_cat, cat in zip(prep["n_cat_list"], cat_list):
        if n_cat > 1:
            one_hots.append(jax.nn.one_hot(jnp.reshape(cat, (-1,)), n_cat,
                                           dtype=jnp.float32))
    x = z.astype(jnp.float32)
    if one_hots:
        x = jnp.concatenate([x] + one_hots, axis=-1)
    library = library.astype(jnp.float32).reshape(x.shape[0], 1)

    batch, d_in = x.shape
    hdim = prep["n_hidden"]
    g, g_pad, tn = prep["n_output"], prep["g_pad"], prep["block_n"]
    num_tiles, n_heads, use_r = prep["num_tiles"], prep["n_heads"], prep["use_r"]

    def const_spec(shape):   # whole-array block, resident across the grid
        return pl.BlockSpec(shape, lambda j: (0,) * len(shape))

    # ---- pass 1: h + softmax stats (sequential over gene tiles) -------------
    h, m, l = pl.pallas_call(
        _backbone_stats_kernel,
        out_shape=(jax.ShapeDtypeStruct((batch, hdim), jnp.bfloat16),
                   jax.ShapeDtypeStruct((batch, 1), jnp.float32),
                   jax.ShapeDtypeStruct((batch, 1), jnp.float32)),
        grid=(num_tiles,),
        in_specs=[
            const_spec((batch, d_in)),                   # x
            const_spec((d_in, hdim)),                    # w1
            const_spec((1, hdim)),                       # b1
            const_spec((1, hdim)),                       # gamma
            const_spec((1, hdim)),                       # beta
            pl.BlockSpec((hdim, tn), lambda j: (0, j)),  # w_scale tile (bf16)
            pl.BlockSpec((1, tn), lambda j: (0, j)),     # b_scale tile
        ],
        out_specs=(const_spec((batch, hdim)),
                   const_spec((batch, 1)),
                   const_spec((batch, 1))),
        compiler_params=pltpu.CompilerParams(
            dimension_semantics=("arbitrary",),
            vmem_limit_bytes=_VMEM_LIMIT_BYTES),
        cost_estimate=pl.CostEstimate(
            flops=2 * batch * (d_in * hdim + hdim * g_pad),
            transcendentals=batch * (g_pad + 2 * num_tiles),
            bytes_accessed=(4 * (batch * d_in + d_in * hdim + 3 * hdim)
                            + 2 * hdim * g_pad + 4 * g_pad
                            + 2 * batch * hdim + 8 * batch)),
    )(x, prep["w1"], prep["b1"], prep["gamma"], prep["beta"],
      prep["w_scale_p"], prep["b_scale_p"])

    # ---- pass 2: fused head projections + normalized outputs ---------------
    n_out = 4 if use_r else 3
    outs = pl.pallas_call(
        functools.partial(_heads_kernel, use_r=use_r),
        out_shape=tuple(jax.ShapeDtypeStruct((batch, g_pad), jnp.float32)
                        for _ in range(n_out)),
        grid=(num_tiles,),
        in_specs=[
            const_spec((batch, hdim)),                                   # h (bf16)
            const_spec((batch, 1)),                                      # m
            const_spec((batch, 1)),                                      # l
            const_spec((batch, 1)),                                      # library
            pl.BlockSpec((1, hdim, n_heads * tn), lambda j: (j, 0, 0)),  # packed W
            pl.BlockSpec((1, 1, n_heads * tn), lambda j: (j, 0, 0)),     # packed b
        ],
        out_specs=tuple(pl.BlockSpec((batch, tn), lambda j: (0, j))
                        for _ in range(n_out)),
        compiler_params=pltpu.CompilerParams(
            dimension_semantics=("parallel",),
            vmem_limit_bytes=_VMEM_LIMIT_BYTES),
        cost_estimate=pl.CostEstimate(
            flops=2 * batch * hdim * n_heads * g_pad,
            transcendentals=2 * batch * g_pad,
            bytes_accessed=(2 * hdim * n_heads * g_pad + 4 * n_heads * g_pad
                            + 4 * n_out * batch * g_pad
                            + 2 * batch * hdim + 12 * batch)),
    )(h, m, l, library, prep["w_heads"], prep["b_heads"])

    if use_r:
        px_scale, px_r, px_rate, px_dropout = outs
        px_r = px_r[:, :g]
    else:
        px_scale, px_rate, px_dropout = outs
        px_r = None
    return px_scale[:, :g], px_r, px_rate[:, :g], px_dropout[:, :g]


# ---------------------------------------------------------------------------
# Init (PyTorch-equivalent) and a pure-JAX reference for validation
# ---------------------------------------------------------------------------
def _linear_params(key, n_in, n_out):
    """nn.Linear default init, weight stored transposed as (n_in, n_out): y = x @ W + b."""
    k1, k2 = jax.random.split(key)
    bound = 1.0 / math.sqrt(n_in)
    w = jax.random.uniform(k1, (n_in, n_out), jnp.float32, -bound, bound)
    b = jax.random.uniform(k2, (1, n_out), jnp.float32, -bound, bound)
    return w, b


def init_decoder_scvi(key, n_input, n_output, n_cat_list=None, n_hidden=128):
    n_cat_list = [c if c > 1 else 0 for c in (n_cat_list or [])]
    n_cat_total = sum(n_cat_list)
    k1, k2, k3, k4 = jax.random.split(key, 4)
    w1, b1 = _linear_params(k1, n_input + n_cat_total, n_hidden)
    ws, bs = _linear_params(k2, n_hidden, n_output)
    wr, br = _linear_params(k3, n_hidden, n_output)
    wd, bd = _linear_params(k4, n_hidden, n_output)
    return {
        "n_cat_list": n_cat_list,
        "w1": w1, "b1": b1,
        "gamma": jnp.ones((1, n_hidden), jnp.float32),   # BatchNorm1d weight init
        "beta": jnp.zeros((1, n_hidden), jnp.float32),   # BatchNorm1d bias init
        "w_scale": ws, "b_scale": bs,
        "w_r": wr, "b_r": br,
        "w_drop": wd, "b_drop": bd,
    }


def _reference_forward(params, dispersion, z, library, *cat_list):
    one_hots = []
    for n_cat, cat in zip(params["n_cat_list"], cat_list):
        if n_cat > 1:
            one_hots.append(jax.nn.one_hot(jnp.reshape(cat, (-1,)), n_cat,
                                           dtype=jnp.float32))
    x = jnp.concatenate([z] + one_hots, axis=-1) if one_hots else z
    h = x @ params["w1"] + params["b1"]
    mean = jnp.mean(h, axis=0, keepdims=True)
    var = jnp.mean((h - mean) ** 2, axis=0, keepdims=True)
    h = (h - mean) / jnp.sqrt(var + BN_EPS) * params["gamma"] + params["beta"]
    h = jnp.maximum(h, 0.0)
    px_scale = jax.nn.softmax(h @ params["w_scale"] + params["b_scale"], axis=-1)
    px_rate = jnp.exp(library) * px_scale
    px_dropout = h @ params["w_drop"] + params["b_drop"]
    px_r = h @ params["w_r"] + params["b_r"] if dispersion == "gene-cell" else None
    return px_scale, px_r, px_rate, px_dropout


if __name__ == "__main__":
    # Small but tiling-exercising shapes: 200 genes with block_n=128 -> 2 gene tiles
    # (last one padded), one categorical covariate with 3 classes.
    B, N_INPUT, N_HIDDEN, N_OUTPUT, N_CAT = 8, 16, 128, 200, 3

    key = jax.random.PRNGKey(0)
    k_param, k_z, k_lib, k_cat = jax.random.split(key, 4)
    params = init_decoder_scvi(k_param, N_INPUT, N_OUTPUT,
                               n_cat_list=[N_CAT], n_hidden=N_HIDDEN)

    z = jax.random.normal(k_z, (B, N_INPUT), jnp.float32)
    library = jax.random.normal(k_lib, (B, 1), jnp.float32)
    cat = jax.random.randint(k_cat, (B, 1), 0, N_CAT)

    # dispersion == 'gene-cell': px_r is computed.
    prep = prepare_decoder_params(params, dispersion="gene-cell", block_n=128)
    px_scale, px_r, px_rate, px_dropout = decoder_scvi_forward(prep, z, library, cat)
    jax.block_until_ready((px_scale, px_r, px_rate, px_dropout))

    assert px_scale.shape == (B, N_OUTPUT)
    assert px_r.shape == (B, N_OUTPUT)
    assert px_rate.shape == (B, N_OUTPUT)
    assert px_dropout.shape == (B, N_OUTPUT)

    # Validate against a plain-JAX f32 reference (heads run in bf16 on the MXU,
    # hence the loose tolerances).
    r_scale, r_r, r_rate, r_drop = _reference_forward(params, "gene-cell",
                                                      z, library, cat)
    assert jnp.allclose(jnp.sum(px_scale, axis=-1), 1.0, atol=2e-3)
    assert jnp.allclose(px_scale, r_scale, rtol=8e-2, atol=2e-3)
    assert jnp.allclose(px_rate, r_rate, rtol=8e-2, atol=1e-2)
    assert jnp.allclose(px_dropout, r_drop, rtol=8e-2, atol=5e-2)
    assert jnp.allclose(px_r, r_r, rtol=8e-2, atol=5e-2)

    # dispersion != 'gene-cell': the r-head is skipped entirely (2-head pack).
    prep_ng = prepare_decoder_params(params, dispersion="gene", block_n=128)
    s2, r2, rate2, d2 = decoder_scvi_forward(prep_ng, z, library, cat)
    jax.block_until_ready((s2, rate2, d2))
    assert r2 is None
    assert s2.shape == (B, N_OUTPUT)
    assert jnp.allclose(s2, px_scale, rtol=1e-3, atol=1e-5)

    print("KERNEL_OK")
</pallas_src>

<mosaic_0001>
module attributes {stable_mosaic.version = 11 : i64} {
  func.func @_backbone_stats_kernel(%arg0: i32, %arg1: memref<8x19xf32, #tpu.memory_space<vmem>>, %arg2: memref<19x128xf32, #tpu.memory_space<vmem>>, %arg3: memref<1x128xf32, #tpu.memory_space<vmem>>, %arg4: memref<1x128xf32, #tpu.memory_space<vmem>>, %arg5: memref<1x128xf32, #tpu.memory_space<vmem>>, %arg6: memref<128x128xbf16, #tpu.memory_space<vmem>>, %arg7: memref<1x128xf32, #tpu.memory_space<vmem>>, %arg8: memref<8x128xbf16, #tpu.memory_space<vmem>>, %arg9: memref<8x1xf32, #tpu.memory_space<vmem>>, %arg10: memref<8x1xf32, #tpu.memory_space<vmem>>) attributes {dimension_semantics = [#tpu.dimension_semantics<arbitrary>], iteration_bounds = array<i64: 2>, scalar_prefetch = 0 : i64, scratch_operands = 0 : i64, tpu.core_type = #tpu.core_type<tc>, window_params = [{pipeline_mode = #tpu.pipeline_mode<synchronous>, transform_indices = @transform_0, window_bounds = array<i64: 8, 19>}, {pipeline_mode = #tpu.pipeline_mode<synchronous>, transform_indices = @transform_1, window_bounds = array<i64: 19, 128>}, {pipeline_mode = #tpu.pipeline_mode<synchronous>, transform_indices = @transform_2, window_bounds = array<i64: 1, 128>}, {pipeline_mode = #tpu.pipeline_mode<synchronous>, transform_indices = @transform_3, window_bounds = array<i64: 1, 128>}, {pipeline_mode = #tpu.pipeline_mode<synchronous>, transform_indices = @transform_4, window_bounds = array<i64: 1, 128>}, {transform_indices = @transform_5, window_bounds = array<i64: 128, 128>}, {transform_indices = @transform_6, window_bounds = array<i64: 1, 128>}, {pipeline_mode = #tpu.pipeline_mode<synchronous>, transform_indices = @transform_7, window_bounds = array<i64: 8, 128>}, {pipeline_mode = #tpu.pipeline_mode<synchronous>, transform_indices = @transform_8, window_bounds = array<i64: 8, 1>}, {pipeline_mode = #tpu.pipeline_mode<synchronous>, transform_indices = @transform_9, window_bounds = array<i64: 8, 1>}]} {
    %c0_i32 = arith.constant 0 : i32
    %0 = arith.cmpi eq, %arg0, %c0_i32 : i32
    %1 = arith.extui %0 : i1 to i32
    %c0_i32_0 = arith.constant 0 : i32
    %2 = arith.cmpi ne, %1, %c0_i32_0 : i32
    scf.if %2 {
      %c0_16 = arith.constant 0 : index
      %c0_17 = arith.constant 0 : index
      %25 = vector.load %arg1[%c0_16, %c0_17] : memref<8x19xf32, #tpu.memory_space<vmem>>, vector<8x19xf32>
      %c0_18 = arith.constant 0 : index
      %c0_19 = arith.constant 0 : index
      %26 = vector.load %arg2[%c0_18, %c0_19] : memref<19x128xf32, #tpu.memory_space<vmem>>, vector<19x128xf32>
      %cst_20 = arith.constant dense<0.000000e+00> : vector<8x128xf32>
      %27 = tpu.matmul %25, %26, %cst_20 {dimension_numbers = #tpu.dot_dimension_numbers<[1], [0], [0], [1], [0, 0, 1, 1], [], []>} : vector<8x19xf32>, vector<19x128xf32>, vector<8x128xf32> -> vector<8x128xf32>
      %c0_21 = arith.constant 0 : index
      %c0_22 = arith.constant 0 : index
      %28 = vector.load %arg3[%c0_21, %c0_22] : memref<1x128xf32, #tpu.memory_space<vmem>>, vector<1x128xf32>
      %29 = vector.broadcast %28 : vector<1x128xf32> to vector<8x128xf32>
      %30 = arith.addf %27, %29 : vector<8x128xf32>
      %cst_23 = arith.constant dense<0.000000e+00> : vector<128xf32>
      %31 = vector.multi_reduction <add>, %30, %cst_23 [0] : vector<8x128xf32> to vector<128xf32>
      %32 = vector.shape_cast %31 : vector<128xf32> to vector<1x128xf32>
      %cst_24 = arith.constant 8.000000e+00 : f32
      %33 = vector.broadcast %cst_24 : f32 to vector<1x128xf32>
      %34 = arith.divf %32, %33 : vector<1x128xf32>
      %35 = vector.broadcast %34 : vector<1x128xf32> to vector<8x128xf32>
      %36 = arith.subf %30, %35 : vector<8x128xf32>
      %37 = arith.mulf %36, %36 : vector<8x128xf32>
      %cst_25 = arith.constant dense<0.000000e+00> : vector<128xf32>
      %38 = vector.multi_reduction <add>, %37, %cst_25 [0] : vector<8x128xf32> to vector<128xf32>
      %39 = vector.shape_cast %38 : vector<128xf32> to vector<1x128xf32>
      %cst_26 = arith.constant 8.000000e+00 : f32
      %40 = vector.broadcast %cst_26 : f32 to vector<1x128xf32>
      %41 = arith.divf %39, %40 : vector<1x128xf32>
      %c0_27 = arith.constant 0 : index
      %c0_28 = arith.constant 0 : index
      %42 = vector.load %arg4[%c0_27, %c0_28] : memref<1x128xf32, #tpu.memory_space<vmem>>, vector<1x128xf32>
      %cst_29 = arith.constant 1.000000e-03 : f32
      %43 = vector.broadcast %cst_29 : f32 to vector<1x128xf32>
      %44 = arith.addf %41, %43 : vector<1x128xf32>
      %45 = math.rsqrt %44 : vector<1x128xf32>
      %46 = arith.mulf %42, %45 : vector<1x128xf32>
      %c0_30 = arith.constant 0 : index
      %c0_31 = arith.constant 0 : index
      %47 = vector.load %arg5[%c0_30, %c0_31] : memref<1x128xf32, #tpu.memory_space<vmem>>, vector<1x128xf32>
      %48 = arith.mulf %34, %46 : vector<1x128xf32>
      %49 = arith.subf %47, %48 : vector<1x128xf32>
      %50 = vector.broadcast %46 : vector<1x128xf32> to vector<8x128xf32>
      %51 = arith.mulf %30, %50 : vector<8x128xf32>
      %52 = vector.broadcast %49 : vector<1x128xf32> to vector<8x128xf32>
      %53 = arith.addf %51, %52 : vector<8x128xf32>
      %cst_32 = arith.constant 0.000000e+00 : f32
      %54 = vector.broadcast %cst_32 : f32 to vector<8x128xf32>
      %55 = arith.maximumf %53, %54 : vector<8x128xf32>
      %56 = arith.truncf %55 : vector<8x128xf32> to vector<8x128xbf16>
      %c0_33 = arith.constant 0 : index
      %c0_34 = arith.constant 0 : index
      %57 = vector.load %arg8[%c0_33, %c0_34] : memref<8x128xbf16, #tpu.memory_space<vmem>>, vector<8x128xbf16>
      tpu.vector_store %arg8[%c0_33, %c0_34], %56 {strides = array<i32>} : memref<8x128xbf16, #tpu.memory_space<vmem>>, vector<8x128xbf16>,
      %cst_35 = arith.constant 0xFF800000 : f32
      %58 = vector.broadcast %cst_35 : f32 to vector<8x1xf32>
      %c0_36 = arith.constant 0 : index
      %c0_37 = arith.constant 0 : index
      %59 = vector.load %arg9[%c0_36, %c0_37] : memref<8x1xf32, #tpu.memory_space<vmem>>, vector<8x1xf32>
      tpu.vector_store %arg9[%c0_36, %c0_37], %58 {strides = array<i32>} : memref<8x1xf32, #tpu.memory_space<vmem>>, vector<8x1xf32>,
      %cst_38 = arith.constant 0.000000e+00 : f32
      %60 = vector.broadcast %cst_38 : f32 to vector<8x1xf32>
      %c0_39 = arith.constant 0 : index
      %c0_40 = arith.constant 0 : index
      %61 = vector.load %arg10[%c0_39, %c0_40] : memref<8x1xf32, #tpu.memory_space<vmem>>, vector<8x1xf32>
      tpu.vector_store %arg10[%c0_39, %c0_40], %60 {strides = array<i32>} : memref<8x1xf32, #tpu.memory_space<vmem>>, vector<8x1xf32>,
    } else {
    }
    %c0 = arith.constant 0 : index
    %c0_1 = arith.constant 0 : index
    %3 = vector.load %arg8[%c0, %c0_1] : memref<8x128xbf16, #tpu.memory_space<vmem>>, vector<8x128xbf16>
    %c0_2 = arith.constant 0 : index
    %c0_3 = arith.constant 0 : index
    %4 = vector.load %arg6[%c0_2, %c0_3] : memref<128x128xbf16, #tpu.memory_space<vmem>>, vector<128x128xbf16>
    %cst = arith.constant dense<0.000000e+00> : vector<8x128xf32>
    %5 = tpu.matmul %3, %4, %cst {dimension_numbers = #tpu.dot_dimension_numbers<[1], [0], [0], [1], [0, 0, 1, 1], [], []>} : vector<8x128xbf16>, vector<128x128xbf16>, vector<8x128xf32> -> vector<8x128xf32>
    %c0_4 = arith.constant 0 : index
    %c0_5 = arith.constant 0 : index
    %6 = vector.load %arg7[%c0_4, %c0_5] : memref<1x128xf32, #tpu.memory_space<vmem>>, vector<1x128xf32>
    %7 = vector.broadcast %6 : vector<1x128xf32> to vector<8x128xf32>
    %8 = arith.addf %5, %7 : vector<8x128xf32>
    %c0_6 = arith.constant 0 : index
    %c0_7 = arith.constant 0 : index
    %9 = vector.load %arg9[%c0_6, %c0_7] : memref<8x1xf32, #tpu.memory_space<vmem>>, vector<8x1xf32>
    %cst_8 = arith.constant dense<0xFF800000> : vector<8xf32>
    %10 = vector.multi_reduction <maximumf>, %8, %cst_8 [1] : vector<8x128xf32> to vector<8xf32>
    %11 = vector.shape_cast %10 : vector<8xf32> to vector<8x1xf32>
    %12 = arith.maximumf %9, %11 : vector<8x1xf32>
    %13 = arith.subf %9, %12 : vector<8x1xf32>
    %14 = math.exp %13 : vector<8x1xf32>
    %c0_9 = arith.constant 0 : index
    %c0_10 = arith.constant 0 : index
    %15 = vector.load %arg10[%c0_9, %c0_10] : memref<8x1xf32, #tpu.memory_space<vmem>>, vector<8x1xf32>
    %16 = arith.mulf %14, %15 : vector<8x1xf32>
    %17 = vector.broadcast %12 : vector<8x1xf32> to vector<8x128xf32>
    %18 = arith.subf %8, %17 : vector<8x128xf32>
    %19 = math.exp %18 : vector<8x128xf32>
    %cst_11 = arith.constant dense<0.000000e+00> : vector<8xf32>
    %20 = vector.multi_reduction <add>, %19, %cst_11 [1] : vector<8x128xf32> to vector<8xf32>
    %21 = vector.shape_cast %20 : vector<8xf32> to vector<8x1xf32>
    %22 = arith.addf %16, %21 : vector<8x1xf32>
    %c0_12 = arith.constant 0 : index
    %c0_13 = arith.constant 0 : index
    %23 = vector.load %arg10[%c0_12, %c0_13] : memref<8x1xf32, #tpu.memory_space<vmem>>, vector<8x1xf32>
    tpu.vector_store %arg10[%c0_12, %c0_13], %22 {strides = array<i32>} : memref<8x1xf32, #tpu.memory_space<vmem>>, vector<8x1xf32>,
    %c0_14 = arith.constant 0 : index
    %c0_15 = arith.constant 0 : index
    %24 = vector.load %arg9[%c0_14, %c0_15] : memref<8x1xf32, #tpu.memory_space<vmem>>, vector<8x1xf32>
    tpu.vector_store %arg9[%c0_14, %c0_15], %12 {strides = array<i32>} : memref<8x1xf32, #tpu.memory_space<vmem>>, vector<8x1xf32>,
    return
  }
  func.func @transform_0(%arg0: i32) -> (i32, i32) {
    %c0_i32 = arith.constant 0 : i32
    %c0_i32_0 = arith.constant 0 : i32
    %c0_i32_1 = arith.constant 0 : i32
    return %c0_i32, %c0_i32_0 : i32, i32
  }
  func.func @transform_1(%arg0: i32) -> (i32, i32) {
    %c0_i32 = arith.constant 0 : i32
    %c0_i32_0 = arith.constant 0 : i32
    %c0_i32_1 = arith.constant 0 : i32
    return %c0_i32, %c0_i32_0 : i32, i32
  }
  func.func @transform_2(%arg0: i32) -> (i32, i32) {
    %c0_i32 = arith.constant 0 : i32
    %c0_i32_0 = arith.constant 0 : i32
    %c0_i32_1 = arith.constant 0 : i32
    return %c0_i32, %c0_i32_0 : i32, i32
  }
  func.func @transform_3(%arg0: i32) -> (i32, i32) {
    %c0_i32 = arith.constant 0 : i32
    %c0_i32_0 = arith.constant 0 : i32
    %c0_i32_1 = arith.constant 0 : i32
    return %c0_i32, %c0_i32_0 : i32, i32
  }
  func.func @transform_4(%arg0: i32) -> (i32, i32) {
    %c0_i32 = arith.constant 0 : i32
    %c0_i32_0 = arith.constant 0 : i32
    %c0_i32_1 = arith.constant 0 : i32
    return %c0_i32, %c0_i32_0 : i32, i32
  }
  func.func @transform_5(%arg0: i32) -> (i32, i32) {
    %c0_i32 = arith.constant 0 : i32
    %c0_i32_0 = arith.constant 0 : i32
    return %c0_i32, %arg0 : i32, i32
  }
  func.func @transform_6(%arg0: i32) -> (i32, i32) {
    %c0_i32 = arith.constant 0 : i32
    %c0_i32_0 = arith.constant 0 : i32
    return %c0_i32, %arg0 : i32, i32
  }
  func.func @transform_7(%arg0: i32) -> (i32, i32) {
    %c0_i32 = arith.constant 0 : i32
    %c0_i32_0 = arith.constant 0 : i32
    %c0_i32_1 = arith.constant 0 : i32
    return %c0_i32, %c0_i32_0 : i32, i32
  }
  func.func @transform_8(%arg0: i32) -> (i32, i32) {
    %c0_i32 = arith.constant 0 : i32
    %c0_i32_0 = arith.constant 0 : i32
    %c0_i32_1 = arith.constant 0 : i32
    return %c0_i32, %c0_i32_0 : i32, i32
  }
  func.func @transform_9(%arg0: i32) -> (i32, i32) {
    %c0_i32 = arith.constant 0 : i32
    %c0_i32_0 = arith.constant 0 : i32
    %c0_i32_1 = arith.constant 0 : i32
    return %c0_i32, %c0_i32_0 : i32, i32
  }
}

</mosaic_0001>

<bundles_post_ra>
// kernel: tpu_custom_call.1
= control target key start
LH: loop header
LB: loop body
LE: loop exit
PB: predicated region body
PF: predicated region fallthrough
CT: control target
= control target key end

     0   :  { %s1396_s0 = inlined_call_operand.hbm [shape: f32[8,19], index: 0, kind: input, shape index: {}]   ;;  %s1397_s1 = inlined_call_operand.hbm [shape: f32[19,128], index: 1, kind: input, shape index: {}]   ;;  %s1398_s2 = inlined_call_operand.vmem [shape: f32[1,128], index: 2, kind: input, shape index: {}]   ;;  %s1399_s3 = inlined_call_operand.vmem [shape: f32[1,128], index: 3, kind: input, shape index: {}]   ;;  %s1400_s4 = inlined_call_operand.vmem [shape: f32[1,128], index: 4, kind: input, shape index: {}]   ;;  %s1401_s5 = inlined_call_operand.hbm [shape: bf16[128,256], index: 5, kind: input, shape index: {}]   ;;  %s1402_s6 = inlined_call_operand.vmem [shape: f32[1,256], index: 6, kind: input, shape index: {}]   ;;  %s1403_s7 = inlined_call_operand.hbm [shape: bf16[8,128], index: 7, kind: output, shape index: {0}]   ;;  %s1404_s8 = inlined_call_operand.vmem [shape: f32[8,1], index: 8, kind: output, shape index: {1}]   ;;  %s1405_s9 = inlined_call_operand.vmem [shape: f32[8,1], index: 9, kind: output, shape index: {2}]  }
   0x1   :  { %1412 = sst [smem:[#allocation15_spill]] %s1396_s0 }
   0x2   :  { %15 = vsyncpa [#allocation3], 0 }
   0x3   :  { %16 = vsyncpa [#allocation6], 0 }
   0x4   :  { %17 = vsyncpa [#allocation4], 0  ;;  %s1133_s30 = smov 0   ;;  %s1135_s10 = smov 0  }
   0x5   :  { %s1137_s11 = smov 0   ;;  %s1139_s12 = smov 0  }
   0x6 LB: > { %s1152_s13 = sadd.s32 4294967295, %s1066_s12   ;;  %s1155_s14 = sadd.s32 1, %s1066_s12   ;;  %s1066_s12 = sphi %s1139_s12, %s1429_s12   ;;  %s1062_s11 = sphi %s1137_s11, %s1433_s11   ;;  %s1058_s10 = sphi %s1135_s10, %s1432_s10   ;;  %s1054_s30 = sphi %s1133_s30, %s1431_s30  }
   0x7   : > { %1413 = sst [smem:[#allocation13_spill]] %s1155_s14  ;;  %s132_s15 = ssub.s32 %s1066_s12, %s1155_s14 }
   0x8   : > { %s135_s16 = sadd.s32 1, %s1062_s11  ;;  %p133_p0 = scmp.eq.s32.totalorder %s132_s15, 0 }
   0x9   : > { %p142_p1 = scmp.ne.s32.totalorder %s1062_s11, %s1058_s10  ;;  %p143_p2 = scmp.eq.s32.totalorder %s1066_s12, 0 }
   0xa   : > { %p148_p3 = scmp.ne.s32.totalorder %s1058_s10, %s1054_s30  ;;  %p1406_p5 = scmp.eq.s32.totalorder %s1152_s13, 0 }
   0xb   : > { %s1165_s17 = scalar_select %p133_p0, %s1062_s11, %s135_s16  }
   0xc   : > { %p1167_p4 = por %p143_p2, %p142_p1  ;;  %p743_p6 = scmp.ge.s32.totalorder %s1066_s12, 1 }
   0xd   : > { %1414 = sst [smem:[#allocation14_spill]] %s1165_s17  ;;  %p248_p7 = scmp.lt.s32.totalorder %s1066_s12, 3 }
   0xe   : > { %p1176_p8 = por %p1406_p5, %p148_p3  ;;  %s1068_s21 = smov [#allocation2]  }
   0xf   : > { %p1181_p10 = pnand %p743_p6, %p248_p7  ;;  %s261_s22 = sshll.u32 %s1068_s21, 4  ;;  %s262_s22 = int_to_ptr.vmem [resolvable:$true] %s261_s22 }
  0x10   : > { %s1416_s19 = scalar_select %p1176_p8, 1, 0 }
  0x11   : > { %s1417_s20 = scalar_select %p1181_p10, 1, 0 }
  0x12   : > { %p829_p11 = pneg %p1181_p10  ;;  %p842_p12 = scmp.lt.s32.totalorder %s1066_s12, 2 }
  0x13   : > { %s1069_s24 = smov [#allocation5]   ;;  %s1420_s0 = sld [smem:[#allocation15_spill]] }
  0x14   : > { %p1190_p13 = pnand %p829_p11, %p1406_p5  ;;  %s271_s25 = sshll.u32 %s1069_s24, 4  ;;  %s1200_s25 = int_to_ptr.vmem [resolvable:$true] %s271_s25 }
  0x15   : > { %p1196_p0 = pnand %p842_p12, %p1167_p4 }
  0x16   : > { %p910_p2 = pneg %p1190_p13 }
  0x17   : > { %s1419_s26 = scalar_select %p1196_p0, 1, 0 }
  0x19   : > { %s908_s29 = scalar_lea.hbm %s1420_s0, 128 }
  0x1a   : > { %p909_p1 = scmp.ne.s32.totalorder %s1420_s0, %s908_s29  ;;  %p915_p4 = scmp.lt.u32.totalorder %s908_s29, %s1420_s0 }
  0x1c   : > { %p911_p3 = pnand %p910_p2, %p909_p1 }
  0x1e   : > { %p912_p6 = pneg %p911_p3 }
  0x20   : > { %p917_p7 = pnand %p915_p4, %p912_p6 }
  0x22   : > { %920 = shalt.err (!%p917_p7)
}
  0x23   : > { %s921_s21 = scalar_lea.vmem %s262_s22, 128  ;;  %p929_p5 = scmp.lt.s32.totalorder %s262_s22, %s262_s22 }
  0x24   : > { %p922_p11 = scmp.ne.s32.totalorder %s262_s22, %s921_s21  ;;  %p930_p8 = scmp.lt.s32.totalorder %s921_s21, %s921_s21 }
  0x26   : > { %p924_p12 = pnand %p922_p11, %p910_p2  ;;  %p931_p10 = por %p930_p8, %p929_p5 }
  0x28   : > { %p925_p9 = pneg %p924_p12 }
  0x2a   : > { %p932_p0 = pnand %p931_p10, %p925_p9 }
  0x2c   : > { %935 = shalt.err (!%p932_p0)
}
  0x2d   : > { %832 = dma.hbm_to_vmem [thread:$0]  (!%p1190_p13), %s1420_s0, 128, %s262_s22, [#allocation3]  }
  0x2e   : > { %s936_s30 = scalar_lea.hbm %s1397_s1, 384 }
  0x2f   : > { %p937_p1 = scmp.ne.s32.totalorder %s1397_s1, %s936_s30  ;;  %p943_p9 = scmp.lt.u32.totalorder %s936_s30, %s1397_s1 }
  0x31   : > { %p939_p5 = pnand %p937_p1, %p910_p2 }
  0x33   : > { %p940_p8 = pneg %p939_p5 }
  0x35   : > { %p945_p10 = pnand %p943_p9, %p940_p8 }
  0x37   : > { %948 = shalt.err (!%p945_p10)
}
  0x38   : > { %s949_s22 = scalar_lea.vmem %s1200_s25, 384  ;;  %p957_p4 = scmp.lt.s32.totalorder %s1200_s25, %s1200_s25 }
  0x39   : > { %p950_p0 = scmp.ne.s32.totalorder %s1200_s25, %s949_s22  ;;  %p958_p7 = scmp.lt.s32.totalorder %s949_s22, %s949_s22 }
  0x3b   : > { %p952_p3 = pnand %p950_p0, %p910_p2  ;;  %p959_p11 = por %p958_p7, %p957_p4 }
  0x3d   : > { %p953_p6 = pneg %p952_p3 }
  0x3f   : > { %p960_p12 = pnand %p959_p11, %p953_p6 }
  0x41   : > { %963 = shalt.err (!%p960_p12)
}
  0x42   : > { %s1070_s24 = smov 128   ;;  %s1071_s27 = smov 8  }
  0x43   : > { %835 = dma.hbm_to_vmem [thread:$0]  (!%p1190_p13), %s1397_s1, 384, %s1200_s25, [#allocation6], %s1070_s24, %s1070_s24, %s1071_s27  }
  0x44   : > { %s294_s30 = sand.u32 1, %s1066_s12   ;;  %s296_s15 = sand.u32 1, %s1062_s11  }
  0x45   : > { %s747_s16 = sshll.u32 %s296_s15, 6  ;;  %s748_s18 = sshll.u32 %s1066_s12, 6 }
  0x46   : > { %s1257_s0 = scalar_lea.hbm %s1401_s5, %s748_s18  ;;  %s298_s23 = scalar_lea.vmem [#allocation7], %s747_s16 }
  0x47   : > { %s304_s17 = sshll.u32 %s298_s23, 4  ;;  %s1261_s14 = scalar_lea.sflag [#allocation3], %s294_s30  ;;  %s1259_s17 = int_to_ptr.vmem [resolvable:$true] %s304_s17 }
  0x48   : > { %s964_s25 = scalar_lea.hbm %s1257_s0, 1024  ;;  %p1421_p2 = scmp.ne.s32.totalorder %s1419_s26, 0 }
  0x49   : > { %p965_p13 = scmp.ne.s32.totalorder %s1257_s0, %s964_s25  ;;  %s969_s28 = scalar_lea.hbm %s1401_s5, 2048 }
  0x4a   : > { %p966_p1 = pneg %p1421_p2  ;;  %p970_p9 = scmp.lt.u32.totalorder %s1257_s0, %s1401_s5 }
  0x4b   : > { %p971_p10 = scmp.lt.u32.totalorder %s969_s28, %s964_s25  ;;  %p973_p3 = scmp.lt.u32.totalorder %s964_s25, %s1257_s0 }
  0x4c   : > { %p967_p5 = pnand %p966_p1, %p965_p13 }
  0x4d   : > { %p972_p0 = por %p971_p10, %p970_p9 }
  0x4e   : > { %p968_p8 = pneg %p967_p5 }
  0x4f   : > { %p974_p6 = por %p973_p3, %p972_p0 }
  0x51   : > { %p975_p4 = pnand %p974_p6, %p968_p8 }
  0x53   : > { %978 = shalt.err (!%p975_p4)
}
  0x54   : > { %s979_s30 = scalar_lea.vmem %s1259_s17, 1024  ;;  %s1072_s16 = smov [#allocation7]  }
  0x55   : > { %p980_p7 = scmp.ne.s32.totalorder %s1259_s17, %s979_s30  ;;  %s984_s18 = sshll.u32 %s1072_s16, 4  ;;  %s985_s18 = int_to_ptr.vmem [resolvable:$false] %s984_s18 }
  0x56   : > { %s986_s21 = scalar_lea.vmem %s985_s18, 2048  ;;  %p987_p13 = scmp.lt.s32.totalorder %s1259_s17, %s985_s18 }
  0x57   : > { %p982_p11 = pnand %p980_p7, %p966_p1  ;;  %p988_p5 = scmp.lt.s32.totalorder %s986_s21, %s979_s30 }
  0x59   : > { %p983_p12 = pneg %p982_p11  ;;  %p989_p9 = por %p988_p5, %p987_p13 }
  0x5b   : > { %p990_p10 = pnand %p989_p9, %p983_p12 }
  0x5d   : > { %993 = shalt.err (!%p990_p10)
}
  0x5e   : > { %s1073_s22 = smov 64   ;;  %s1074_s23 = smov 4  }
  0x5f   : > { %839 = dma.hbm_to_vmem [thread:$0]  (!%p1421_p2), %s1257_s0, 1024, %s1259_s17, %s1261_s14, %s1070_s24, %s1073_s22, %s1074_s23  }
  0x60   : > { %p1422_p1 = scmp.ne.s32.totalorder %s1417_s20, 0 }
  0x61   : > { %p1423_p8 = scmp.eq.s32.totalorder (!%p1422_p1), %s1152_s13, 0 }
  0x62   : > { %322 = sbr.rel (%p1422_p1) target bundleno = 1080 (0x438), region = 48 }
  0x69   : > { %1037 = dma.done.wait (%p1423_p8), [#allocation3], 128   ;;  %p1424_p0 = pmov %p1423_p8 }
  0x6b   : > { %1039 = vsyncadd (%p1424_p0), [#allocation3], 4294967168  ;;  %p1425_p3 = pmov %p1424_p0 }
  0x6c   : > { %p1426_p6 = pmov %p1424_p0 }
  0x6d   : > { %1041 = dma.done.wait (%p1425_p3), [#allocation6], 384  }
  0x6e   : > { %1043 = vsyncadd (%p1426_p6), [#allocation6], 4294966912  ;;  %s332_s26 = sand.u32 1, %s1152_s13   ;;  %s334_s0 = sand.u32 1, %s1058_s10  }
  0x6f   : > { %s752_s14 = sshll.u32 %s334_s0, 6  ;;  %s333_s17 = scalar_lea.sflag [#allocation3], %s332_s26 }
  0x70   : > { %s1302_s20 = scalar_lea.vmem [#allocation7], %s752_s14  ;;  %p1427_p2 = scmp.ne.s32.totalorder %s1416_s19, 0 }
  0x72   : > { %1045 = dma.done.wait (%p1427_p2), %s333_s17, 1024  }
  0x73   : > { %1047 = vsyncadd (%p1427_p2), %s333_s17, 4294966272  ;;  %p369_p4 = scmp.lt.s32.totalorder %s1152_s13, 1  ;;  %p1428_p7 = scmp.ne.s32.totalorder %s1152_s13, 0 }
  0x74   : > { %v378_v0 = vld [vmem:[#allocation5] sm:$0xff] (!%p1428_p7)  ;;  %v379_v1 = vld [vmem:[#allocation5 + $0x8] sm:$0xff] (!%p1428_p7)  ;;  %vm507_vm0 = vcmask (!%p1428_p7), 7168   ;;  %v1075_v2 = vmov (!%p1428_p7), 0.0|0.0   ;;  %v1076_v4 = vmov (!%p1428_p7), -inf   ;;  %v1077_v5 = vmov (!%p1428_p7), 0.0  }
  0x75   : > { %s1310_s24 = scalar_select %p369_p4, %s1152_s13, 1 }
  0x76   : > { %376 = sbr.rel (%p1428_p7) target bundleno = 399 (0x18f), region = 64  ;;  %812 = vmatprep.subr.bf16.mxu0 (!%p1428_p7), %v1075_v2  ;;  %v813_v3 = vpack.c.bf16 (!%p1428_p7), %v379_v1, %v378_v0  ;;  %508 = vst.msk [vmem:[%s1404_s8] sm:$0xff] (!%p1428_p7), %vm507_vm0, %v1076_v4  ;;  %509 = vst.msk [vmem:[%s1405_s9] sm:$0xff] (!%p1428_p7), %vm507_vm0, %v1077_v5  ;;  %vm1078_vm1 = vmmov (!%p1428_p7), 0   ;;  %v380_v6 = vld [vmem:[#allocation5 + $0x10] sm:$0x7] (!%p1428_p7)  ;;  %v491_v29 = vlaneseq (!%p1428_p7) }
  0x77   : > { %s371_s27 = scalar_lea.vmem %s1402_s6, %s1310_s24  ;;  %789 = vmatprep.mubr.msk.f32.mxu0 (!%p1428_p7), %vm1078_vm1, %v1077_v5  ;;  %vm392_vm2 = vcmask (!%p1428_p7), 1042432   ;;  %v377_v7 = vld [vmem:[#allocation2] sm:$0xff] (!%p1428_p7)  ;;  %vm388_vm3 = vcmask (!%p1428_p7), 154624  }
  0x78   : > { %814 = vmatpush3.bf16.msra.mxu0 (!%p1428_p7), %v813_v3  ;;  %v754_v8 = vld [vmem:[%s1398_s2] ss:$0 sm:$0xff] (!%p1428_p7)  ;;  %v492_v30 = vshrl.u32 (!%p1428_p7), %v491_v29, 7 }
  0x79   : > { %787 = vmatprep.subr.mxu0 (!%p1428_p7), %v1077_v5  ;;  %v483_v31 = vld [vmem:[%s1399_s3] sm:$0x1] (!%p1428_p7) }
  0x7a   : > { %v493_v32 = vsub.s32 (!%p1428_p7), 0, %v492_v30  ;;  %v487_v35 = vld [vmem:[%s1400_s4] sm:$0x1] (!%p1428_p7) }
  0x7c   : > { %788 = vmatpush3.msk.msra.mxu0 (!%p1428_p7), %vm392_vm2, %v380_v6 }
  0x7d   : > { %790 = vmatmul.mubr.msk.f32.vlgmr.msra.gmra.mrb[0].mxu0 %vm388_vm3, %v377_v7 }
 0x150   : > { %v462_v9 = vpop.f32.mrb[0].mxu0 }
 0x151   : > { %v463_v10 = vadd.f32 %v754_v8, %v462_v9  ;;  %v791_v11 = vpop.f32.mrb[1].mxu0 }
 0x153   : > { %v466_v12 = vrot.slane %v463_v10, 4 }
 0x155   : > { %v467_v13 = vadd.f32 %v466_v12, %v463_v10 }
 0x157   : > { %v468_v14 = vrot.slane %v467_v13, 2 }
 0x159   : > { %v469_v15 = vadd.f32 %v468_v14, %v467_v13 }
 0x15b   : > { %v470_v16 = vrot.slane %v469_v15, 1 }
 0x15d   : > { %v471_v17 = vadd.f32 %v470_v16, %v469_v15 }
 0x15f   : > { %v473_v18 = vmul.f32 0.125, %v471_v17 }
 0x161   : > { %v474_v19 = vsub.f32 %v463_v10, %v473_v18 }
 0x163   : > { %v475_v20 = vmul.f32 %v474_v19, %v474_v19 }
 0x165   : > { %v476_v21 = vrot.slane %v475_v20, 4 }
 0x167   : > { %v477_v22 = vadd.f32 %v476_v21, %v475_v20 }
 0x169   : > { %v478_v23 = vrot.slane %v477_v22, 2 }
 0x16b   : > { %v479_v24 = vadd.f32 %v478_v23, %v477_v22 }
 0x16d   : > { %v480_v25 = vrot.slane %v479_v24, 1 }
 0x16f   : > { %v481_v26 = vadd.f32 %v480_v25, %v479_v24 }
 0x171   : > { %v482_v27 = vmul.f32 0.125, %v481_v26 }
 0x173   : > { %v484_v28 = vadd.f32 0.001, %v482_v27 }
 0x175   : > { %893 = vrsqrt.f32 %v484_v28 }
 0x17f   : > { %v894_v33 = vpop.eup %893 }
 0x180   : > { %v486_v34 = vmul.f32 %v894_v33, %v483_v31 }
 0x182   : > { %v488_v36 = vmul.f32 %v486_v34, %v473_v18  ;;  %v494_v37 = vrot.slane %v486_v34, %v493_v32 }
 0x184   : > { %v489_v38 = vsub.f32 %v487_v35, %v488_v36  ;;  %v496_v39 = vmul.f32 %v494_v37, %v463_v10 }
 0x186   : > { %v501_v40 = vrot.slane %v489_v38, %v493_v32 }
 0x188   : > { %v503_v41 = vadd.f32 %v501_v40, %v496_v39 }
 0x18a   : > { %v504_v42 = vmax.f32 %v503_v41, 0.0 }
 0x18c   : > { %v505_v43 = vpack.c.bf16 %v504_v42, %v504_v42 }
 0x18e   : > { %506 = vst [vmem:[#allocation8] sm:$0xf] %v505_v43 }
 0x18f PF: > { %v896_v44 = vld [vmem:[%s1302_s20] sm:$0xff]   ;;  %v1079_v45 = vmov 0.0   ;;  %v897_v46 = vld [vmem:[%s1302_s20 + $0x8] sm:$0xff]   ;;  %vm1080_vm4 = vmmov 0   ;;  %v898_v47 = vld [vmem:[%s1302_s20 + $0x10] sm:$0xff]   ;;  %v1081_v60 = vmov 0  }
 0x190   : > { %792 = vmatprep.subr.bf16.mxu0 %v1079_v45  ;;  %808 = vmatprep.mubr.msk.bf16.mxu0 %vm1080_vm4, %v1079_v45  ;;  %v899_v48 = vld [vmem:[%s1302_s20 + $0x18] sm:$0xff]   ;;  %v900_v49 = vld [vmem:[%s1302_s20 + $0x20] sm:$0xff]   ;;  %v901_v50 = vld [vmem:[%s1302_s20 + $0x28] sm:$0xff]   ;;  %vm642_vm5 = vcmask 7168   ;;  %p845_p11 = scmp.eq.s32.totalorder %s1152_s13, 1  ;;  %s1082_s25 = smov [#allocation8]  }
 0x191   : > { %793 = vmatpush3.bf16.msra.mxu0 %v896_v44  ;;  %v902_v51 = vld [vmem:[%s1302_s20 + $0x30] sm:$0xff]   ;;  %v903_v52 = vld [vmem:[%s1302_s20 + $0x38] sm:$0xff]   ;;  %v757_v54 = vld [vmem:[%s371_s27] ss:$0 sm:$0xff]  ;;  %895 = vset.pattern.permute.xlu0 %v1081_v60  ;;  %s652_s12 = sshll.u32 %s1082_s25, 4  ;;  %s653_s12 = int_to_ptr.vmem [resolvable:$true] %s652_s12 }
 0x192   : > { %794 = vmatprep.subr.bf16.mxu0 %v1079_v45  ;;  %v622_v61 = vld [vmem:[%s1404_s8] sm:$0xff]  ;;  %s994_s27 = scalar_lea.vmem %s653_s12, 64  ;;  %p1001_p9 = scmp.lt.s32.totalorder %s653_s12, %s653_s12 }
 0x193   : > { %p995_p12 = scmp.ne.s32.totalorder %s653_s12, %s994_s27  ;;  %p1002_p10 = scmp.lt.s32.totalorder %s994_s27, %s994_s27 }
 0x195   : > { %795 = vmatpush3.bf16.msra.mxu0 %v897_v46  ;;  %v510_v53 = vld [vmem:[#allocation8] sm:$0xf]  ;;  %p996_p13 = pnand %p995_p12, %p845_p11  ;;  %p1003_p1 = por %p1002_p10, %p1001_p9 }
 0x196   : > { %796 = vmatprep.subr.bf16.mxu0 %v1079_v45 }
 0x197   : > { %p997_p5 = pneg %p996_p13 }
 0x199   : > { %797 = vmatpush3.bf16.msra.mxu0 %v898_v47  ;;  %p1004_p8 = pnand %p1003_p1, %p997_p5 }
 0x19a   : > { %798 = vmatprep.subr.bf16.mxu0 %v1079_v45 }
 0x19d   : > { %799 = vmatpush3.bf16.msra.mxu0 %v899_v48 }
 0x19e   : > { %800 = vmatprep.subr.bf16.mxu0 %v1079_v45 }
 0x1a1   : > { %801 = vmatpush3.bf16.msra.mxu0 %v900_v49 }
 0x1a2   : > { %802 = vmatprep.subr.bf16.mxu0 %v1079_v45 }
 0x1a5   : > { %803 = vmatpush3.bf16.msra.mxu0 %v901_v50 }
 0x1a6   : > { %804 = vmatprep.subr.bf16.mxu0 %v1079_v45 }
 0x1a9   : > { %805 = vmatpush3.bf16.msra.mxu0 %v902_v51 }
 0x1aa   : > { %806 = vmatprep.subr.bf16.mxu0 %v1079_v45 }
 0x1ad   : > { %807 = vmatpush3.bf16.msra.mxu0 %v903_v52 }
 0x1b0   : > { %809 = vmatmul.mubr.bf16.vlgmr.msra.gmra.mrb[0].mxu0 %v510_v53 }
 0x283   : > { %v616_v55 = vpop.f32.mrb[0].mxu0 }
 0x284   : > { %v617_v56 = vadd.f32 %v757_v54, %v616_v55  ;;  %v810_v57 = vpop.f32.mrb[1].mxu0 }
 0x285   : > { %v619_v58 = vpop.f32.mrb[2].mxu0 }
 0x286   : > { %623 = vmax.xlane.f32.xlu0 %v617_v56  ;;  %v811_v59 = vpop.f32.mrb[3].mxu0 }
 0x313   : > { %v624_v62 = vpop.xlane.xlu0 %623 }
 0x314   : > { %v625_v63 = vmax.f32 %v622_v61, %v624_v62 }
 0x316   : > { %v626_v0 = vsub.f32 %v622_v61, %v625_v63  ;;  %644 = vst.msk [vmem:[%s1404_s8] sm:$0xff] %vm642_vm5, %v625_v63  ;;  %633 = vperm.xlu0 %895, %v625_v63  }
 0x395   : > { %v634_v1 = vpop.permute.xlu0 %633 }
 0x396   : > { %v636_v2 = vsub.f32 %v617_v56, %v634_v1 }
 0x398   : > { %v637_v3 = vmul.f32 1.442695, %v636_v2 }
 0x39a   : > { %904 = vpow2.f32 %v637_v3 }
 0x3a4   : > { %v905_v4 = vpop.eup %904 }
 0x3a5   : > { %639 = vadd.xlane.f32.xlu1 %v905_v4 }
 0x3a6   : > { %1007 = shalt.err (!%p1004_p8)
}
 0x3a7   : > { %s1008_s29 = scalar_lea.hbm %s1403_s7, 64 }
 0x3a8   : > { %p1009_p0 = scmp.ne.s32.totalorder %s1403_s7, %s1008_s29  ;;  %p1014_p2 = scmp.lt.u32.totalorder %s1008_s29, %s1403_s7 }
 0x3aa   : > { %p1010_p3 = pnand %p1009_p0, %p845_p11 }
 0x3ac   : > { %p1011_p6 = pneg %p1010_p3 }
 0x3ae   : > { %p1016_p4 = pnand %p1014_p2, %p1011_p6 }
 0x3b0   : > { %1019 = shalt.err (!%p1016_p4)
}
 0x3b1   : > { %826 = dma.vmem_to_hbm [thread:$0]  (%p845_p11), %s653_s12, 64, %s1403_s7, [#allocation4]   ;;  %v627_v5 = vmul.f32 1.442695, %v626_v0  ;;  %v629_v7 = vld [vmem:[%s1405_s9] sm:$0xff] }
 0x3b3   : > { %906 = vpow2.f32 %v627_v5 }
 0x3bd   : > { %v907_v6 = vpop.eup %906 }
 0x3be   : > { %v630_v8 = vmul.f32 %v907_v6, %v629_v7 }
 0x432   : > { %v640_v9 = vpop.xlane.xlu1 %639 }
 0x433   : > { %v641_v10 = vadd.f32 %v640_v9, %v630_v8 }
 0x435   : > { %643 = vst.msk [vmem:[%s1405_s9] sm:$0xff] %vm642_vm5, %v641_v10 }
 0x436   : > { %1049 = dma.done.wait (%p845_p11), [#allocation4], 64  }
 0x437   : > { %1051 = vsyncadd (%p845_p11), [#allocation4], 4294967232 }
 0x438 PF: > { %s1429_s12 = sld [smem:[#allocation13_spill]]  ;;  %s1430_s17 = sld [smem:[#allocation14_spill]] }
 0x439   : > { %s1431_s30 = smov %s1058_s10  ;;  %s1432_s10 = smov %s1062_s11 }
 0x43e   : > { %p20_p7 = scmp.ge.s32.totalorder %s1429_s12, 4   ;;  %s1433_s11 = smov %s1430_s17 }
 0x440   :  { %22 = sbr.rel (!%p20_p7) target bundleno = 6 (0x6), region = 115 }
 0x447   :  { %677 = vsyncpa [#allocation3], 1 }
 0x448   :  { %679 = vsyncpa [#allocation3 + $0x1], 1 }
 0x449   :  { %680 = vsyncpa [#allocation6], 1 }
 0x44a   :  { %681 = vsyncpa [#allocation4], 1 }
 0x44b   :  { %683 = vsyncpa [#allocation4 + $0x1], 1 }

</bundles_post_ra>
